<compile_context>
chip_gen: v7x
topology: tpu7x:2x2x1
jax: 0.10.0
libtpu: 0.0.40
codegen_flags: <defaults>
</compile_context>

<pallas_src>
import functools
import math

import jax
import jax.numpy as jnp
from jax import lax
from jax.experimental import pallas as pl
from jax.experimental.pallas import tpu as pltpu

_LANES = 128
_SUM_BUF_BYTES = 4 * 1024 * 1024   # per-input per-buffer budget (f32-equiv), sum/mean
_NONE_BUF_BYTES = 2 * 1024 * 1024  # per-array per-buffer budget, reduction='none'
_VMEM_LIMIT_BYTES = 32 * 1024 * 1024


def _elem_loss(pred, target):
    # Stand-in for the abstract loss_func (elementwise part).
    return jnp.abs(pred - target)


# ----------------------------- kernels --------------------------------------


def _partial_sum_kernel(pred_ref, tgt_ref, out_ref, *, tile_rows, cols,
                        valid_rows_last, out_rows):
    """Per-tile partial sum of the elementwise loss -> aligned (out_rows, cols)."""
    elem = _elem_loss(pred_ref[...].astype(jnp.float32),
                      tgt_ref[...].astype(jnp.float32))

    def _fold(x):
        if out_rows == 8:
            # (tile_rows, cols) -> (8, cols): pure VALU adds of sublane groups.
            return jnp.sum(x.reshape(tile_rows // 8, 8, cols), axis=0)
        # Single small full-extent block (tile_rows == R, not a multiple of 8).
        return jnp.sum(x, axis=0, keepdims=True)

    if valid_rows_last >= tile_rows:
        # No padded rows anywhere: never mask.
        out_ref[...] = _fold(elem)
    else:
        # Only the final grid step carries out-of-bounds (garbage) rows, so the
        # iota/compare/select is only paid there.
        is_last = pl.program_id(0) == pl.num_programs(0) - 1

        @pl.when(jnp.logical_not(is_last))
        def _():
            out_ref[...] = _fold(elem)

        @pl.when(is_last)
        def _():
            row = lax.broadcasted_iota(jnp.int32, (tile_rows, cols), 0)
            out_ref[...] = _fold(jnp.where(row < valid_rows_last, elem, 0.0))


def _elemwise_kernel(pred_ref, tgt_ref, out_ref, *, loss_weight):
    """reduction='none': elementwise loss scaled by loss_weight, native dtype."""
    p = pred_ref[...].astype(out_ref.dtype)
    t = tgt_ref[...].astype(out_ref.dtype)
    out_ref[...] = (_elem_loss(p, t) * loss_weight).astype(out_ref.dtype)


# ----------------------------- helpers ---------------------------------------


def _sublane(dtype):
    return {4: 8, 2: 16, 1: 32}.get(jnp.dtype(dtype).itemsize, 8)


def _lane_view(shape, n):
    """Zero-copy 2-D (R, C) view: lane-dense (n//128, 128) when possible,
    otherwise collapse leading dims and keep the trailing dim."""
    if n % _LANES == 0:
        return n // _LANES, _LANES
    if len(shape) >= 2:
        c = int(shape[-1])
        return n // c, c
    # TODO(synk): a huge unaligned 1-D tensor becomes a single (1, n) block;
    #             tile the lane axis if this ever exceeds VMEM.
    return 1, n


def _pick_tile_rows(rows, cols, sub, budget_bytes):
    cap = max(sub, ((budget_bytes // (cols * 4)) // sub) * sub)
    if rows <= cap:
        return rows            # single full-extent block (always a legal block)
    return cap                 # multiple of sub (>= 8); last block is a boundary block


# ----------------------------- wrapper ---------------------------------------


class BaseLossPallas:
    """JAX/Pallas port of BaseLoss.

    Args:
        weight: stored only (the base class never applies it in forward).
        reduction: 'none' | 'mean' | 'sum'
        loss_name: name string.
        loss_weight: scalar multiplier applied to the loss.
    """

    def __init__(self, weight=None, reduction="mean", loss_name="loss_",
                 loss_weight=1.0):
        assert reduction in ("none", "mean", "sum")
        self.weight = weight
        self.reduction = reduction
        self.loss_weight = float(loss_weight)
        self._loss_name = loss_name

    @property
    def loss_name(self):
        return self._loss_name

    def __call__(self, pred, target):
        orig_shape = pred.shape
        out_dtype = jnp.promote_types(pred.dtype, target.dtype)
        n = int(math.prod(orig_shape)) if len(orig_shape) else 1
        n = int(n)

        if n == 0:
            # Degenerate empty input: mirror torch semantics, no kernel launch.
            if self.reduction == "none":
                return jnp.zeros(orig_shape, out_dtype)
            val = 0.0 if self.reduction == "sum" else float("nan")
            return jnp.asarray(val * self.loss_weight, dtype=out_dtype)

        rows, cols = _lane_view(orig_shape, n)
        p2d = pred.reshape(rows, cols)      # free view of contiguous data
        t2d = target.reshape(rows, cols)

        sub = max(_sublane(pred.dtype), _sublane(target.dtype), _sublane(out_dtype))
        budget = _NONE_BUF_BYTES if self.reduction == "none" else _SUM_BUF_BYTES
        tile_rows = _pick_tile_rows(rows, cols, sub, budget)
        num_tiles = -(-rows // tile_rows)
        valid_rows_last = rows - (num_tiles - 1) * tile_rows

        in_spec = pl.BlockSpec((tile_rows, cols), lambda i: (i, 0))
        bytes_in = n * (jnp.dtype(pred.dtype).itemsize
                        + jnp.dtype(target.dtype).itemsize)
        params = pltpu.CompilerParams(
            dimension_semantics=("parallel",),
            vmem_limit_bytes=_VMEM_LIMIT_BYTES,
        )

        if self.reduction == "none":
            out2d = pl.pallas_call(
                functools.partial(_elemwise_kernel, loss_weight=self.loss_weight),
                out_shape=jax.ShapeDtypeStruct((rows, cols), out_dtype),
                grid=(num_tiles,),
                in_specs=[in_spec, in_spec],
                out_specs=pl.BlockSpec((tile_rows, cols), lambda i: (i, 0)),
                compiler_params=params,
                cost_estimate=pl.CostEstimate(
                    flops=3 * n,
                    transcendentals=0,
                    bytes_accessed=bytes_in + n * jnp.dtype(out_dtype).itemsize),
            )(p2d, t2d)
            return out2d.reshape(orig_shape)    # free view back

        # 'mean' / 'sum': per-tile aligned (8, cols) partial sums on a
        # "parallel" grid (megacore-friendly); tiny collapse happens in XLA.
        out_rows = 8 if tile_rows % 8 == 0 else 1   # out_rows=1 only for a single small block
        partials = pl.pallas_call(
            functools.partial(_partial_sum_kernel, tile_rows=tile_rows, cols=cols,
                              valid_rows_last=valid_rows_last, out_rows=out_rows),
            out_shape=jax.ShapeDtypeStruct((num_tiles * out_rows, cols), jnp.float32),
            grid=(num_tiles,),
            in_specs=[in_spec, in_spec],
            out_specs=pl.BlockSpec((out_rows, cols), lambda i: (i, 0)),
            compiler_params=params,
            cost_estimate=pl.CostEstimate(
                flops=3 * n,
                transcendentals=0,
                bytes_accessed=bytes_in + num_tiles * out_rows * cols * 4),
        )(p2d, t2d)

        denom = float(n) if self.reduction == "mean" else 1.0
        total = jnp.sum(partials, dtype=jnp.float32)
        return (total * (self.loss_weight / denom)).astype(out_dtype)


# ------------------------------- main -----------------------------------------

if __name__ == "__main__":
    key = jax.random.PRNGKey(0)
    k1, k2, k3, k4 = jax.random.split(key, 4)
    pred = jax.random.normal(k1, (2, 4, 16, 16), dtype=jnp.float32)
    target = jax.random.normal(k2, (2, 4, 16, 16), dtype=jnp.float32)

    # mean reduction (default)
    loss_mean = BaseLossPallas(reduction="mean", loss_weight=2.0)(pred, target)
    jax.block_until_ready(loss_mean)
    ref_mean = jnp.mean(jnp.abs(pred - target)) * 2.0
    assert jnp.allclose(loss_mean, ref_mean, rtol=1e-5, atol=1e-5)

    # sum reduction
    loss_sum = BaseLossPallas(reduction="sum", loss_weight=0.5)(pred, target)
    jax.block_until_ready(loss_sum)
    ref_sum = jnp.sum(jnp.abs(pred - target)) * 0.5
    assert jnp.allclose(loss_sum, ref_sum, rtol=1e-5, atol=1e-5)

    # no reduction
    loss_none = BaseLossPallas(reduction="none", loss_weight=3.0)(pred, target)
    jax.block_until_ready(loss_none)
    ref_none = jnp.abs(pred - target) * 3.0
    assert loss_none.shape == pred.shape
    assert loss_none.dtype == pred.dtype
    assert jnp.allclose(loss_none, ref_none, rtol=1e-5, atol=1e-5)

    # native bf16 streaming path (cast to f32 for accumulation happens in-kernel,
    # final scalar is returned in bf16 like the torch reference would)
    pred_bf = pred.astype(jnp.bfloat16)
    target_bf = target.astype(jnp.bfloat16)
    loss_bf = BaseLossPallas(reduction="mean", loss_weight=1.0)(pred_bf, target_bf)
    jax.block_until_ready(loss_bf)
    ref_bf = jnp.mean(jnp.abs(pred_bf.astype(jnp.float32)
                              - target_bf.astype(jnp.float32)))
    assert loss_bf.dtype == jnp.bfloat16
    assert jnp.allclose(loss_bf.astype(jnp.float32), ref_bf, rtol=2e-2, atol=2e-2)

    # non-lane-aligned shape: exercises the zero-copy (R, last_dim) view and the
    # masked boundary-row path (no jnp.pad / output slice anywhere).
    p_odd = jax.random.normal(k3, (3, 5, 7), dtype=jnp.float32)
    t_odd = jax.random.normal(k4, (3, 5, 7), dtype=jnp.float32)
    loss_odd_sum = BaseLossPallas(reduction="sum", loss_weight=1.5)(p_odd, t_odd)
    jax.block_until_ready(loss_odd_sum)
    ref_odd_sum = jnp.sum(jnp.abs(p_odd - t_odd)) * 1.5
    assert jnp.allclose(loss_odd_sum, ref_odd_sum, rtol=1e-5, atol=1e-5)

    loss_odd_none = BaseLossPallas(reduction="none", loss_weight=1.0)(p_odd, t_odd)
    jax.block_until_ready(loss_odd_none)
    assert loss_odd_none.shape == p_odd.shape
    assert jnp.allclose(loss_odd_none, jnp.abs(p_odd - t_odd), rtol=1e-5, atol=1e-5)

    print("KERNEL_OK")
</pallas_src>

<mosaic_0001>
module attributes {stable_mosaic.version = 11 : i64} {
  func.func @_partial_sum_kernel(%arg0: i32, %arg1: memref<16x128xf32, #tpu.memory_space<vmem>>, %arg2: memref<16x128xf32, #tpu.memory_space<vmem>>, %arg3: memref<8x128xf32, #tpu.memory_space<vmem>>) attributes {dimension_semantics = [#tpu.dimension_semantics<parallel>], iteration_bounds = array<i64: 1>, scalar_prefetch = 0 : i64, scratch_operands = 0 : i64, tpu.core_type = #tpu.core_type<tc>, window_params = [{transform_indices = @transform_0, window_bounds = array<i64: 16, 128>}, {transform_indices = @transform_1, window_bounds = array<i64: 16, 128>}, {transform_indices = @transform_2, window_bounds = array<i64: 8, 128>}]} {
    %c0 = arith.constant 0 : index
    %c0_0 = arith.constant 0 : index
    %0 = vector.load %arg1[%c0, %c0_0] : memref<16x128xf32, #tpu.memory_space<vmem>>, vector<16x128xf32>
    %c0_1 = arith.constant 0 : index
    %c0_2 = arith.constant 0 : index
    %1 = vector.load %arg2[%c0_1, %c0_2] : memref<16x128xf32, #tpu.memory_space<vmem>>, vector<16x128xf32>
    %2 = arith.subf %0, %1 : vector<16x128xf32>
    %3 = math.absf %2 : vector<16x128xf32>
    %4 = vector.shape_cast %3 : vector<16x128xf32> to vector<2x8x128xf32>
    %cst = arith.constant dense<0.000000e+00> : vector<8x128xf32>
    %5 = vector.multi_reduction <add>, %4, %cst [0] : vector<2x8x128xf32> to vector<8x128xf32>
    %c0_3 = arith.constant 0 : index
    %c0_4 = arith.constant 0 : index
    %6 = vector.load %arg3[%c0_3, %c0_4] : memref<8x128xf32, #tpu.memory_space<vmem>>, vector<8x128xf32>
    tpu.vector_store %arg3[%c0_3, %c0_4], %5 {strides = array<i32>} : memref<8x128xf32, #tpu.memory_space<vmem>>, vector<8x128xf32>,
    return
  }
  func.func @transform_0(%arg0: i32) -> (i32, i32) {
    %c0_i32 = arith.constant 0 : i32
    %c0_i32_0 = arith.constant 0 : i32
    return %arg0, %c0_i32 : i32, i32
  }
  func.func @transform_1(%arg0: i32) -> (i32, i32) {
    %c0_i32 = arith.constant 0 : i32
    %c0_i32_0 = arith.constant 0 : i32
    return %arg0, %c0_i32 : i32, i32
  }
  func.func @transform_2(%arg0: i32) -> (i32, i32) {
    %c0_i32 = arith.constant 0 : i32
    %c0_i32_0 = arith.constant 0 : i32
    return %arg0, %c0_i32 : i32, i32
  }
}

</mosaic_0001>

<bundles_post_ra>
// kernel: tpu_custom_call.1
= control target key start
LH: loop header
LB: loop body
LE: loop exit
PB: predicated region body
PF: predicated region fallthrough
CT: control target
= control target key end

     0   :  { %7 = vsyncpa [#allocation3], 0  ;;  %s199_s0 = inlined_call_operand.hbm [shape: f32[16,128], index: 0, kind: input, shape index: {}]   ;;  %s200_s1 = inlined_call_operand.hbm [shape: f32[16,128], index: 1, kind: input, shape index: {}]   ;;  %s201_s2 = inlined_call_operand.hbm [shape: f32[8,128], index: 2, kind: output, shape index: {}]  }
   0x1   :  { %8 = vsyncpa [#allocation6], 0 }
   0x2   :  { %9 = vsyncpa [#allocation4], 0  ;;  %s143_s9 = smov [#allocation2]   ;;  %s71_s13 = scalar_lea.hbm %s199_s0, 256 }
   0x3   :  { %s15_s10 = sshll.u32 %s143_s9, 4  ;;  %p72_p0 = scmp.ne.s32.totalorder %s199_s0, %s71_s13  ;;  %s16_s10 = int_to_ptr.vmem [resolvable:$true] %s15_s10 }
   0x4   :  { %p75_p1 = scmp.lt.u32.totalorder %s71_s13, %s199_s0 }
   0x6   :  { %p77_p2 = pnand %p75_p1, %p72_p0 }
   0x8   :  { %80 = shalt.err (!%p77_p2)
}
   0x9   :  { %s81_s18 = scalar_lea.vmem %s16_s10, 256  ;;  %p86_p4 = scmp.lt.s32.totalorder %s16_s10, %s16_s10 }
   0xa   :  { %p82_p3 = scmp.ne.s32.totalorder %s16_s10, %s81_s18  ;;  %p87_p5 = scmp.lt.s32.totalorder %s81_s18, %s81_s18 }
   0xc   :  { %p88_p6 = por %p87_p5, %p86_p4 }
   0xe   :  { %p89_p7 = pnand %p88_p6, %p82_p3 }
  0x10   :  { %92 = shalt.err (!%p89_p7)
}
  0x11   :  { %s144_s19 = smov 128   ;;  %s145_s20 = smov 8  }
  0x12   :  { %21 = dma.hbm_to_vmem [thread:$0]  %s199_s0, 256, %s16_s10, [#allocation3], %s144_s19, %s144_s19, %s145_s20  }
  0x13   :  { %s146_s23 = smov [#allocation5]   ;;  %s93_s27 = scalar_lea.hbm %s200_s1, 256 }
  0x14   :  { %s27_s24 = sshll.u32 %s146_s23, 4  ;;  %p94_p8 = scmp.ne.s32.totalorder %s200_s1, %s93_s27  ;;  %s28_s24 = int_to_ptr.vmem [resolvable:$true] %s27_s24 }
  0x15   :  { %p97_p9 = scmp.lt.u32.totalorder %s93_s27, %s200_s1 }
  0x17   :  { %p99_p10 = pnand %p97_p9, %p94_p8 }
  0x19   :  { %102 = shalt.err (!%p99_p10)
}
  0x1a   :  { %s103_s4 = scalar_lea.vmem %s28_s24, 256  ;;  %p108_p12 = scmp.lt.s32.totalorder %s28_s24, %s28_s24 }
  0x1b   :  { %p104_p11 = scmp.ne.s32.totalorder %s28_s24, %s103_s4  ;;  %p109_p13 = scmp.lt.s32.totalorder %s103_s4, %s103_s4 }
  0x1d   :  { %p110_p0 = por %p109_p13, %p108_p12 }
  0x1f   :  { %p111_p1 = pnand %p110_p0, %p104_p11 }
  0x21   :  { %114 = shalt.err (!%p111_p1)
}
  0x22   :  { %33 = dma.hbm_to_vmem [thread:$0]  %s200_s1, 256, %s28_s24, [#allocation6], %s144_s19, %s144_s19, %s145_s20  }
  0x23   :  { %137 = dma.done.wait [#allocation3], 256  }
  0x24   :  { %138 = vsyncadd [#allocation3], 4294967040 }
  0x25   :  { %139 = dma.done.wait [#allocation6], 256  }
  0x26   :  { %140 = vsyncadd [#allocation6], 4294967040  ;;  %v40_v0 = vld [vmem:[#allocation2] sm:$0xff]  ;;  %v41_v1 = vld [vmem:[#allocation2 + $0x8] sm:$0xff]  ;;  %s147_s6 = smov [#allocation7]  }
  0x27   :  { %v42_v2 = vld [vmem:[#allocation5] sm:$0xff]  ;;  %v43_v3 = vld [vmem:[#allocation5 + $0x8] sm:$0xff]  ;;  %s56_s7 = sshll.u32 %s147_s6, 4  ;;  %s57_s7 = int_to_ptr.vmem [resolvable:$true] %s56_s7 }
  0x28   :  { %v44_v4 = vsub.f32 %v40_v0, %v42_v2  ;;  %v45_v5 = vsub.f32 %v41_v1, %v43_v3  ;;  %s115_s8 = scalar_lea.vmem %s57_s7, 128  ;;  %p120_p3 = scmp.lt.s32.totalorder %s57_s7, %s57_s7 }
  0x29   :  { %p116_p2 = scmp.ne.s32.totalorder %s57_s7, %s115_s8  ;;  %p121_p4 = scmp.lt.s32.totalorder %s115_s8, %s115_s8 }
  0x2a   :  { %v46_v6 = vand.u32 2147483647, %v44_v4  ;;  %v47_v7 = vand.u32 2147483647, %v45_v5 }
  0x2b   :  { %p122_p5 = por %p121_p4, %p120_p3 }
  0x2c   :  { %v48_v8 = vadd.f32 %v47_v7, %v46_v6 }
  0x2d   :  { %p123_p6 = pnand %p122_p5, %p116_p2 }
  0x2e   :  { %49 = vst [vmem:[#allocation7] sm:$0xff] %v48_v8 }
  0x2f   :  { %126 = shalt.err (!%p123_p6)
}
  0x30   :  { %s127_s10 = scalar_lea.hbm %s201_s2, 128 }
  0x31   :  { %p128_p7 = scmp.ne.s32.totalorder %s201_s2, %s127_s10  ;;  %p131_p8 = scmp.lt.u32.totalorder %s127_s10, %s201_s2 }
  0x33   :  { %p133_p9 = pnand %p131_p8, %p128_p7 }
  0x35   :  { %136 = shalt.err (!%p133_p9)
}
  0x36   :  { %59 = dma.vmem_to_hbm [thread:$0]  %s57_s7, 128, %s201_s2, [#allocation4]  }
  0x37   :  { %141 = dma.done.wait [#allocation4], 128  }
  0x38   :  { %142 = vsyncadd [#allocation4], 4294967168 }
  0x39   :  { %63 = vsyncpa [#allocation3], 1 }
  0x3a   :  { %64 = vsyncpa [#allocation6], 1 }
  0x3b   :  { %65 = vsyncpa [#allocation4], 1 }

</bundles_post_ra>
